<compile_context>
chip_gen: v7x
topology: tpu7x:2x2x1
jax: 0.10.0
libtpu: 0.0.40
codegen_flags: <defaults>
</compile_context>

<pallas_src>
import functools

import jax
import jax.numpy as jnp
from jax import lax
from jax.experimental import pallas as pl
from jax.experimental.pallas import tpu as pltpu

EMBEDDING_DIM = 32
HIDDEN_DIM = 256
VOCAB = 256
SUBLANE = 8


def _round_up(x, m):
    return (x + m - 1) // m * m


def _largest_divisor_leq(n, cap):
    d = min(n, max(1, cap))
    while n % d:
        d -= 1
    return d


def _arnn_chunk_kernel(xemb_ref, wih_ref, whh_ref, b_ref,
                       hs_ref, hlast_ref, h_carry,
                       *, tc, bt, unroll):
    """One (batch-tile, time-chunk) grid step of the RNN recurrence.

    xemb_ref  : (tc, bt, E)  f32   embedded inputs for this chunk
    wih_ref   : (E, H)       f32   W_ih^T
    whh_ref   : (H, H)       bf16  W_hh^T (recurrent weights, bf16 MXU operand)
    b_ref     : (1, H)       f32   b_ih + b_hh
    hs_ref    : (tc, bt, H)  f32   hidden-state history for this chunk (output;
                                   also used as staging buffer for xproj)
    hlast_ref : (bt, H)      f32   final hidden state for this batch tile
    h_carry   : (bt, H)      f32   persistent VMEM scratch: loop carry across
                                   time chunks
    """
    c = pl.program_id(1)                      # time-chunk index (inner axis)

    @pl.when(c == 0)
    def _():
        h_carry[...] = jnp.zeros_like(h_carry)

    # Hoisted, time-independent input projection for this chunk: one
    # throughput-bound matmul, off the serial critical path.  Staged directly
    # in the VMEM-resident output block, which the loop overwrites in place.
    xproj = jnp.dot(xemb_ref[...].reshape(tc * bt, EMBEDDING_DIM),
                    wih_ref[...],
                    preferred_element_type=jnp.float32) + b_ref[...]
    hs_ref[...] = xproj.reshape(tc, bt, HIDDEN_DIM)

    def step(t, h):
        # Serial path: (bt, H) @ (H, H) bf16 matmul (f32 acc) + tanh.
        pre = hs_ref[t] + jnp.dot(h.astype(whh_ref.dtype), whh_ref[...],
                                  preferred_element_type=jnp.float32)
        h_new = jnp.tanh(pre)
        hs_ref[t] = h_new                     # lane-dense (bt, 256) store
        return h_new

    h_final = lax.fori_loop(0, tc, step, h_carry[...], unroll=unroll)
    h_carry[...] = h_final
    # Final-hidden output block index is constant across time chunks, so these
    # writes stay VMEM-resident and are flushed to HBM once per batch tile.
    hlast_ref[...] = h_final

    # TODO(synk): software-pipeline the next chunk's xproj under the serial
    # loop's MXU slack (needs a manual-DMA xemb path, memory_space=pl.ANY).


@functools.partial(jax.jit, static_argnames=("time_chunk", "batch_tile"))
def arnn_forward(x_ids, params, *, time_chunk=128, batch_tile=64):
    """x_ids: (T, B) int32.  Returns (output (T, B, 1), hidden (1, B, H))."""
    emb = params["embedding"]           # (VOCAB, E)
    w_ih = params["w_ih"]               # (H, E)  PyTorch layout
    w_hh = params["w_hh"]               # (H, H)
    b_ih = params["b_ih"]               # (H,)
    b_hh = params["b_hh"]               # (H,)
    w_lin = params["w_lin"]             # (1, H)
    b_lin = params["b_lin"]             # (1,)

    T, B = x_ids.shape
    E, H = EMBEDDING_DIM, HIDDEN_DIM

    # Pad batch to the sublane width so every (bt, H) tile is dense; padded
    # rows are independent of the real ones and are sliced away afterwards.
    Bp = _round_up(max(B, SUBLANE), SUBLANE)
    bt = min(Bp, _round_up(max(batch_tile, SUBLANE), SUBLANE))
    while Bp % bt:
        bt -= SUBLANE
    tc = _largest_divisor_leq(T, time_chunk)
    unroll = min(8, tc)
    grid = (Bp // bt, T // tc)          # (batch tiles [parallel], time chunks)

    # Glue (parallel, non-recurrent): embedding gather, batch padding,
    # weight transposes, bias fusion, recurrent-weight bf16 cast.
    embedded = jnp.take(emb, x_ids, axis=0).astype(jnp.float32)    # (T, B, E)
    embedded = jnp.pad(embedded, ((0, 0), (0, Bp - B), (0, 0)))    # (T, Bp, E)
    wih_t = w_ih.T.astype(jnp.float32)                             # (E, H)
    whh_t = w_hh.T.astype(jnp.bfloat16)                            # (H, H) bf16
    b_comb = (b_ih + b_hh).reshape(1, H).astype(jnp.float32)

    kernel = functools.partial(_arnn_chunk_kernel, tc=tc, bt=bt, unroll=unroll)

    cost = pl.CostEstimate(
        flops=int(2 * T * Bp * H * H + 2 * T * Bp * E * H),
        transcendentals=int(T * Bp * H),
        bytes_accessed=int(T * Bp * E * 4 + T * Bp * H * 4 + Bp * H * 4
                           + E * H * 4 + H * H * 2 + H * 4),
    )

    hs, h_last = pl.pallas_call(
        kernel,
        out_shape=(
            jax.ShapeDtypeStruct((T, Bp, H), jnp.float32),   # all hidden states
            jax.ShapeDtypeStruct((Bp, H), jnp.float32),      # final hidden
        ),
        grid=grid,
        in_specs=[
            pl.BlockSpec((tc, bt, E), lambda b, c: (c, b, 0)),
            pl.BlockSpec((E, H), lambda b, c: (0, 0)),
            pl.BlockSpec((H, H), lambda b, c: (0, 0)),
            pl.BlockSpec((1, H), lambda b, c: (0, 0)),
        ],
        out_specs=(
            pl.BlockSpec((tc, bt, H), lambda b, c: (c, b, 0)),
            pl.BlockSpec((bt, H), lambda b, c: (b, 0)),
        ),
        scratch_shapes=[pltpu.VMEM((bt, H), jnp.float32)],   # h carry
        compiler_params=pltpu.CompilerParams(
            dimension_semantics=("parallel", "arbitrary")),
        cost_estimate=cost,
    )(embedded, wih_t, whh_t, b_comb)

    hs = hs[:, :B, :]                                              # (T, B, H)

    # Hoisted output projection + sigmoid (one lane-dense gemm, outside the
    # serial path).
    out = jax.nn.sigmoid(jnp.einsum("tbh,oh->tbo", hs, w_lin) + b_lin)
    hidden = h_last[:B][None]                                      # (1, B, H)
    return out, hidden


def arnn_reference(x_ids, params):
    """Pure-JAX f32 reference matching PyTorch nn.RNN(tanh) semantics."""
    emb = params["embedding"]
    w_ih, w_hh = params["w_ih"], params["w_hh"]
    b_ih, b_hh = params["b_ih"], params["b_hh"]
    w_lin, b_lin = params["w_lin"], params["b_lin"]

    T, B = x_ids.shape
    embedded = jnp.take(emb, x_ids, axis=0)     # (T, B, E)
    h0 = jnp.zeros((B, HIDDEN_DIM), jnp.float32)

    def step(h, x_t):
        h_new = jnp.tanh(x_t @ w_ih.T + b_ih + h @ w_hh.T + b_hh)
        return h_new, h_new

    h_last, hs = lax.scan(step, h0, embedded)
    out = jax.nn.sigmoid(hs @ w_lin.T + b_lin)  # (T, B, 1)
    return out, h_last.reshape(1, B, HIDDEN_DIM)


def init_params(key):
    k = jax.random.split(key, 7)
    H, E = HIDDEN_DIM, EMBEDDING_DIM
    s = 1.0 / jnp.sqrt(H)
    return {
        "embedding": jax.random.normal(k[0], (VOCAB, E), jnp.float32),
        "w_ih": jax.random.uniform(k[1], (H, E), jnp.float32, -s, s),
        "w_hh": jax.random.uniform(k[2], (H, H), jnp.float32, -s, s),
        "b_ih": jax.random.uniform(k[3], (H,), jnp.float32, -s, s),
        "b_hh": jax.random.uniform(k[4], (H,), jnp.float32, -s, s),
        "w_lin": jax.random.uniform(k[5], (1, H), jnp.float32, -s, s),
        "b_lin": jax.random.uniform(k[6], (1,), jnp.float32, -s, s),
    }


if __name__ == "__main__":
    key = jax.random.PRNGKey(0)
    params = init_params(key)

    T, B = 8, 2
    x_ids = jax.random.randint(jax.random.PRNGKey(1), (T, B), 0, VOCAB,
                               dtype=jnp.int32)

    # time_chunk=4 -> grid=(1, 2): exercises the chunked, pipelined grid path
    # (carry scratch + per-chunk hoisted xproj) even at this toy sequence length.
    out, hidden = arnn_forward(x_ids, params, time_chunk=4)
    out = jax.block_until_ready(out)
    hidden = jax.block_until_ready(hidden)

    out_ref, hidden_ref = arnn_reference(x_ids, params)
    assert out.shape == (T, B, 1) and hidden.shape == (1, B, HIDDEN_DIM)
    # bf16 recurrent weights (f32 accumulate) -> relaxed tolerance vs. the
    # f32 reference, per the perf review.
    assert jnp.allclose(out, out_ref, atol=2e-2, rtol=2e-2), \
        float(jnp.max(jnp.abs(out - out_ref)))
    assert jnp.allclose(hidden, hidden_ref, atol=5e-2, rtol=5e-2), \
        float(jnp.max(jnp.abs(hidden - hidden_ref)))

    print("KERNEL_OK")
</pallas_src>

<mosaic_0001>
module attributes {stable_mosaic.version = 11 : i64} {
  func.func @_arnn_chunk_kernel(%arg0: i32, %arg1: i32, %arg2: memref<4x8x32xf32, #tpu.memory_space<vmem>>, %arg3: memref<32x256xf32, #tpu.memory_space<vmem>>, %arg4: memref<256x256xbf16, #tpu.memory_space<vmem>>, %arg5: memref<1x256xf32, #tpu.memory_space<vmem>>, %arg6: memref<4x8x256xf32, #tpu.memory_space<vmem>>, %arg7: memref<8x256xf32, #tpu.memory_space<vmem>>, %arg8: memref<8x256xf32, #tpu.memory_space<vmem>>) attributes {dimension_semantics = [#tpu.dimension_semantics<parallel>, #tpu.dimension_semantics<arbitrary>], iteration_bounds = array<i64: 1, 2>, scalar_prefetch = 0 : i64, scratch_operands = 1 : i64, tpu.core_type = #tpu.core_type<tc>, window_params = [{transform_indices = @transform_0, window_bounds = array<i64: 4, 8, 32>}, {pipeline_mode = #tpu.pipeline_mode<synchronous>, transform_indices = @transform_1, window_bounds = array<i64: 32, 256>}, {pipeline_mode = #tpu.pipeline_mode<synchronous>, transform_indices = @transform_2, window_bounds = array<i64: 256, 256>}, {pipeline_mode = #tpu.pipeline_mode<synchronous>, transform_indices = @transform_3, window_bounds = array<i64: 1, 256>}, {transform_indices = @transform_4, window_bounds = array<i64: 4, 8, 256>}, {transform_indices = @transform_5, window_bounds = array<i64: 8, 256>}]} {
    %c0_i32 = arith.constant 0 : i32
    %0 = arith.cmpi eq, %arg1, %c0_i32 : i32
    %1 = arith.extui %0 : i1 to i32
    %c0_i32_0 = arith.constant 0 : i32
    %2 = arith.cmpi ne, %1, %c0_i32_0 : i32
    scf.if %2 {
      %cst_45 = arith.constant 0.000000e+00 : f32
      %63 = vector.broadcast %cst_45 : f32 to vector<8x256xf32>
      %c0_46 = arith.constant 0 : index
      %c0_47 = arith.constant 0 : index
      %64 = vector.load %arg8[%c0_46, %c0_47] : memref<8x256xf32, #tpu.memory_space<vmem>>, vector<8x256xf32>
      tpu.vector_store %arg8[%c0_46, %c0_47], %63 {strides = array<i32>} : memref<8x256xf32, #tpu.memory_space<vmem>>, vector<8x256xf32>,
    } else {
    }
    %c0 = arith.constant 0 : index
    %c0_1 = arith.constant 0 : index
    %c0_2 = arith.constant 0 : index
    %3 = vector.load %arg2[%c0, %c0_1, %c0_2] : memref<4x8x32xf32, #tpu.memory_space<vmem>>, vector<4x8x32xf32>
    %4 = vector.shape_cast %3 : vector<4x8x32xf32> to vector<32x32xf32>
    %c0_3 = arith.constant 0 : index
    %c0_4 = arith.constant 0 : index
    %5 = vector.load %arg3[%c0_3, %c0_4] : memref<32x256xf32, #tpu.memory_space<vmem>>, vector<32x256xf32>
    %cst = arith.constant dense<0.000000e+00> : vector<32x256xf32>
    %6 = tpu.matmul %4, %5, %cst {dimension_numbers = #tpu.dot_dimension_numbers<[1], [0], [0], [1], [0, 0, 1, 1], [], []>} : vector<32x32xf32>, vector<32x256xf32>, vector<32x256xf32> -> vector<32x256xf32>
    %c0_5 = arith.constant 0 : index
    %c0_6 = arith.constant 0 : index
    %7 = vector.load %arg5[%c0_5, %c0_6] : memref<1x256xf32, #tpu.memory_space<vmem>>, vector<1x256xf32>
    %8 = vector.broadcast %7 : vector<1x256xf32> to vector<32x256xf32>
    %9 = arith.addf %6, %8 : vector<32x256xf32>
    %10 = vector.shape_cast %9 : vector<32x256xf32> to vector<4x8x256xf32>
    %c0_7 = arith.constant 0 : index
    %c0_8 = arith.constant 0 : index
    %c0_9 = arith.constant 0 : index
    %11 = vector.load %arg6[%c0_7, %c0_8, %c0_9] : memref<4x8x256xf32, #tpu.memory_space<vmem>>, vector<4x8x256xf32>
    tpu.vector_store %arg6[%c0_7, %c0_8, %c0_9], %10 {strides = array<i32>} : memref<4x8x256xf32, #tpu.memory_space<vmem>>, vector<4x8x256xf32>,
    %c0_10 = arith.constant 0 : index
    %c0_11 = arith.constant 0 : index
    %12 = vector.load %arg8[%c0_10, %c0_11] : memref<8x256xf32, #tpu.memory_space<vmem>>, vector<8x256xf32>
    %c0_i32_12 = arith.constant 0 : i32
    %13 = arith.index_cast %c0_i32_12 : i32 to index
    %c0_13 = arith.constant 0 : index
    %c0_14 = arith.constant 0 : index
    %14 = vector.load %arg6[%13, %c0_13, %c0_14] : memref<4x8x256xf32, #tpu.memory_space<vmem>>, vector<1x8x256xf32>
    %15 = vector.shape_cast %14 : vector<1x8x256xf32> to vector<8x256xf32>
    %16 = arith.truncf %12 : vector<8x256xf32> to vector<8x256xbf16>
    %c0_15 = arith.constant 0 : index
    %c0_16 = arith.constant 0 : index
    %17 = vector.load %arg4[%c0_15, %c0_16] : memref<256x256xbf16, #tpu.memory_space<vmem>>, vector<256x256xbf16>
    %cst_17 = arith.constant dense<0.000000e+00> : vector<8x256xf32>
    %18 = tpu.matmul %16, %17, %cst_17 {dimension_numbers = #tpu.dot_dimension_numbers<[1], [0], [0], [1], [0, 0, 1, 1], [], []>} : vector<8x256xbf16>, vector<256x256xbf16>, vector<8x256xf32> -> vector<8x256xf32>
    %19 = arith.addf %15, %18 : vector<8x256xf32>
    %20 = math.tanh %19 : vector<8x256xf32>
    %21 = arith.index_cast %c0_i32_12 : i32 to index
    %c0_18 = arith.constant 0 : index
    %c0_19 = arith.constant 0 : index
    %22 = vector.load %arg6[%21, %c0_18, %c0_19] : memref<4x8x256xf32, #tpu.memory_space<vmem>>, vector<1x8x256xf32>
    %23 = vector.shape_cast %22 : vector<1x8x256xf32> to vector<8x256xf32>
    %24 = vector.shape_cast %20 : vector<8x256xf32> to vector<1x8x256xf32>
    tpu.vector_store %arg6[%21, %c0_18, %c0_19], %24 {strides = array<i32>} : memref<4x8x256xf32, #tpu.memory_space<vmem>>, vector<1x8x256xf32>,
    %c1_i32 = arith.constant 1 : i32
    %25 = arith.index_cast %c1_i32 : i32 to index
    %c0_20 = arith.constant 0 : index
    %c0_21 = arith.constant 0 : index
    %26 = vector.load %arg6[%25, %c0_20, %c0_21] : memref<4x8x256xf32, #tpu.memory_space<vmem>>, vector<1x8x256xf32>
    %27 = vector.shape_cast %26 : vector<1x8x256xf32> to vector<8x256xf32>
    %28 = arith.truncf %20 : vector<8x256xf32> to vector<8x256xbf16>
    %c0_22 = arith.constant 0 : index
    %c0_23 = arith.constant 0 : index
    %29 = vector.load %arg4[%c0_22, %c0_23] : memref<256x256xbf16, #tpu.memory_space<vmem>>, vector<256x256xbf16>
    %cst_24 = arith.constant dense<0.000000e+00> : vector<8x256xf32>
    %30 = tpu.matmul %28, %29, %cst_24 {dimension_numbers = #tpu.dot_dimension_numbers<[1], [0], [0], [1], [0, 0, 1, 1], [], []>} : vector<8x256xbf16>, vector<256x256xbf16>, vector<8x256xf32> -> vector<8x256xf32>
    %31 = arith.addf %27, %30 : vector<8x256xf32>
    %32 = math.tanh %31 : vector<8x256xf32>
    %33 = arith.index_cast %c1_i32 : i32 to index
    %c0_25 = arith.constant 0 : index
    %c0_26 = arith.constant 0 : index
    %34 = vector.load %arg6[%33, %c0_25, %c0_26] : memref<4x8x256xf32, #tpu.memory_space<vmem>>, vector<1x8x256xf32>
    %35 = vector.shape_cast %34 : vector<1x8x256xf32> to vector<8x256xf32>
    %36 = vector.shape_cast %32 : vector<8x256xf32> to vector<1x8x256xf32>
    tpu.vector_store %arg6[%33, %c0_25, %c0_26], %36 {strides = array<i32>} : memref<4x8x256xf32, #tpu.memory_space<vmem>>, vector<1x8x256xf32>,
    %c2_i32 = arith.constant 2 : i32
    %37 = arith.index_cast %c2_i32 : i32 to index
    %c0_27 = arith.constant 0 : index
    %c0_28 = arith.constant 0 : index
    %38 = vector.load %arg6[%37, %c0_27, %c0_28] : memref<4x8x256xf32, #tpu.memory_space<vmem>>, vector<1x8x256xf32>
    %39 = vector.shape_cast %38 : vector<1x8x256xf32> to vector<8x256xf32>
    %40 = arith.truncf %32 : vector<8x256xf32> to vector<8x256xbf16>
    %c0_29 = arith.constant 0 : index
    %c0_30 = arith.constant 0 : index
    %41 = vector.load %arg4[%c0_29, %c0_30] : memref<256x256xbf16, #tpu.memory_space<vmem>>, vector<256x256xbf16>
    %cst_31 = arith.constant dense<0.000000e+00> : vector<8x256xf32>
    %42 = tpu.matmul %40, %41, %cst_31 {dimension_numbers = #tpu.dot_dimension_numbers<[1], [0], [0], [1], [0, 0, 1, 1], [], []>} : vector<8x256xbf16>, vector<256x256xbf16>, vector<8x256xf32> -> vector<8x256xf32>
    %43 = arith.addf %39, %42 : vector<8x256xf32>
    %44 = math.tanh %43 : vector<8x256xf32>
    %45 = arith.index_cast %c2_i32 : i32 to index
    %c0_32 = arith.constant 0 : index
    %c0_33 = arith.constant 0 : index
    %46 = vector.load %arg6[%45, %c0_32, %c0_33] : memref<4x8x256xf32, #tpu.memory_space<vmem>>, vector<1x8x256xf32>
    %47 = vector.shape_cast %46 : vector<1x8x256xf32> to vector<8x256xf32>
    %48 = vector.shape_cast %44 : vector<8x256xf32> to vector<1x8x256xf32>
    tpu.vector_store %arg6[%45, %c0_32, %c0_33], %48 {strides = array<i32>} : memref<4x8x256xf32, #tpu.memory_space<vmem>>, vector<1x8x256xf32>,
    %c3_i32 = arith.constant 3 : i32
    %49 = arith.index_cast %c3_i32 : i32 to index
    %c0_34 = arith.constant 0 : index
    %c0_35 = arith.constant 0 : index
    %50 = vector.load %arg6[%49, %c0_34, %c0_35] : memref<4x8x256xf32, #tpu.memory_space<vmem>>, vector<1x8x256xf32>
    %51 = vector.shape_cast %50 : vector<1x8x256xf32> to vector<8x256xf32>
    %52 = arith.truncf %44 : vector<8x256xf32> to vector<8x256xbf16>
    %c0_36 = arith.constant 0 : index
    %c0_37 = arith.constant 0 : index
    %53 = vector.load %arg4[%c0_36, %c0_37] : memref<256x256xbf16, #tpu.memory_space<vmem>>, vector<256x256xbf16>
    %cst_38 = arith.constant dense<0.000000e+00> : vector<8x256xf32>
    %54 = tpu.matmul %52, %53, %cst_38 {dimension_numbers = #tpu.dot_dimension_numbers<[1], [0], [0], [1], [0, 0, 1, 1], [], []>} : vector<8x256xbf16>, vector<256x256xbf16>, vector<8x256xf32> -> vector<8x256xf32>
    %55 = arith.addf %51, %54 : vector<8x256xf32>
    %56 = math.tanh %55 : vector<8x256xf32>
    %57 = arith.index_cast %c3_i32 : i32 to index
    %c0_39 = arith.constant 0 : index
    %c0_40 = arith.constant 0 : index
    %58 = vector.load %arg6[%57, %c0_39, %c0_40] : memref<4x8x256xf32, #tpu.memory_space<vmem>>, vector<1x8x256xf32>
    %59 = vector.shape_cast %58 : vector<1x8x256xf32> to vector<8x256xf32>
    %60 = vector.shape_cast %56 : vector<8x256xf32> to vector<1x8x256xf32>
    tpu.vector_store %arg6[%57, %c0_39, %c0_40], %60 {strides = array<i32>} : memref<4x8x256xf32, #tpu.memory_space<vmem>>, vector<1x8x256xf32>,
    %c4_i32 = arith.constant 4 : i32
    %c0_41 = arith.constant 0 : index
    %c0_42 = arith.constant 0 : index
    %61 = vector.load %arg8[%c0_41, %c0_42] : memref<8x256xf32, #tpu.memory_space<vmem>>, vector<8x256xf32>
    tpu.vector_store %arg8[%c0_41, %c0_42], %56 {strides = array<i32>} : memref<8x256xf32, #tpu.memory_space<vmem>>, vector<8x256xf32>,
    %c0_43 = arith.constant 0 : index
    %c0_44 = arith.constant 0 : index
    %62 = vector.load %arg7[%c0_43, %c0_44] : memref<8x256xf32, #tpu.memory_space<vmem>>, vector<8x256xf32>
    tpu.vector_store %arg7[%c0_43, %c0_44], %56 {strides = array<i32>} : memref<8x256xf32, #tpu.memory_space<vmem>>, vector<8x256xf32>,
    return
  }
  func.func @transform_0(%arg0: i32, %arg1: i32) -> (i32, i32, i32) {
    %c0_i32 = arith.constant 0 : i32
    %c0_i32_0 = arith.constant 0 : i32
    return %arg1, %arg0, %c0_i32 : i32, i32, i32
  }
  func.func @transform_1(%arg0: i32, %arg1: i32) -> (i32, i32) {
    %c0_i32 = arith.constant 0 : i32
    %c0_i32_0 = arith.constant 0 : i32
    %c0_i32_1 = arith.constant 0 : i32
    return %c0_i32, %c0_i32_0 : i32, i32
  }
  func.func @transform_2(%arg0: i32, %arg1: i32) -> (i32, i32) {
    %c0_i32 = arith.constant 0 : i32
    %c0_i32_0 = arith.constant 0 : i32
    %c0_i32_1 = arith.constant 0 : i32
    return %c0_i32, %c0_i32_0 : i32, i32
  }
  func.func @transform_3(%arg0: i32, %arg1: i32) -> (i32, i32) {
    %c0_i32 = arith.constant 0 : i32
    %c0_i32_0 = arith.constant 0 : i32
    %c0_i32_1 = arith.constant 0 : i32
    return %c0_i32, %c0_i32_0 : i32, i32
  }
  func.func @transform_4(%arg0: i32, %arg1: i32) -> (i32, i32, i32) {
    %c0_i32 = arith.constant 0 : i32
    %c0_i32_0 = arith.constant 0 : i32
    return %arg1, %arg0, %c0_i32 : i32, i32, i32
  }
  func.func @transform_5(%arg0: i32, %arg1: i32) -> (i32, i32) {
    %c0_i32 = arith.constant 0 : i32
    %c0_i32_0 = arith.constant 0 : i32
    return %arg0, %c0_i32 : i32, i32
  }
}

</mosaic_0001>

<bundles_post_ra>
// kernel: arnn_forward.1
= control target key start
LH: loop header
LB: loop body
LE: loop exit
PB: predicated region body
PF: predicated region fallthrough
CT: control target
= control target key end

     0   :  { %s1830_s18 = smov 0   ;;  %s1832_s19 = smov 0   ;;  %s2224_s0 = inlined_call_operand.vmem [shape: f32[8,8,32], index: 0, kind: input, shape index: {}]   ;;  %s2225_s1 = inlined_call_operand.vmem [shape: f32[32,256], index: 1, kind: input, shape index: {}]   ;;  %s2226_s2 = inlined_call_operand.vmem [shape: bf16[256,256], index: 2, kind: input, shape index: {}]   ;;  %s2227_s3 = inlined_call_operand.vmem [shape: f32[1,256], index: 3, kind: input, shape index: {}]   ;;  %s2228_s4 = inlined_call_operand.vmem [shape: f32[8,8,256], index: 4, kind: output, shape index: {0}]   ;;  %s2229_s5 = inlined_call_operand.vmem [shape: f32[8,256], index: 5, kind: output, shape index: {1}]  }
   0x1   :  { %s1834_s20 = smov 0  }
   0x2 LB: > { %s25_s21 = sadd.s32 1, %s1792_s19  ;;  %p1521_p0 = scmp.ge.s32.totalorder %s1796_s20, 1  ;;  %s1796_s20 = sphi %s1834_s20, %s16_s20   ;;  %s1792_s19 = sphi %s1832_s19, %s2231_s19   ;;  %s1788_s18 = sphi %s1830_s18, %s2230_s18  }
   0x3   : > { %p26_p1 = scmp.ge.s32.totalorder %s25_s21, 2  ;;  %p210_p2 = scmp.lt.s32.totalorder %s1796_s20, 3 }
   0x5   : > { %s2233_s21 = smov (%p26_p1, %s25_s21), 0  ;;  %p211_p3 = pnand %p1521_p0, %p210_p2 }
   0x6   : > { %s1522_s22 = sshll.u32 (!%p211_p3), %s1788_s18, 2  ;;  %p1527_p5 = scmp.ne.s32.totalorder (!%p211_p3), %s1788_s18, 0 }
   0x7   : > { %214 = sbr.rel (%p211_p3) target bundleno = 1001 (0x3e9), region = 36  ;;  %p252_p4 = scmp.lt.s32.totalorder (!%p211_p3), %s1522_s22, 7 }
   0xe   : > { %s2235_s22 = smov (!%p252_p4, %s1522_s22), 7  ;;  %279 = sbr.rel (%p1527_p5) target bundleno = 21 (0x15), region = 40 }
   0xf   : > { %s1523_s23 = sshll.u32 %s2235_s22, 3  ;;  %s1675_s24 = sshll.u32 %s2235_s22, 4  ;;  %v1798_v0 = vmov (!%p1527_p5), 0.0  }
  0x10   : > { %s1851_s27 = scalar_lea.vmem %s2224_s0, %s1523_s23  ;;  %s1856_s30 = scalar_lea.vmem %s2228_s4, %s1675_s24  ;;  %280 = vst [vmem:[#allocation2] sm:$0xff] (!%p1527_p5), %v1798_v0  ;;  %281 = vst [vmem:[#allocation2 + $0x8] sm:$0xff] (!%p1527_p5), %v1798_v0 }
  0x15 PF: > { %v1861_v1 = vld [vmem:[%s2226_s2 + $0x4] ss:$8 sps:$4 sm:$0xff]   ;;  %v1866_v2 = vld [vmem:[%s2226_s2] ss:$8 sps:$4 sm:$0xff]   ;;  %v1799_v3 = vmov 0.0   ;;  %v289_v10 = vld [vmem:[%s2225_s1 + $0x18] sm:$0xff]  ;;  %v296_v54 = vlaneseq }
  0x16   : > { %383 = vmatprep.mubr.f32.mxu0 %v1799_v3  ;;  %614 = vmatprep.subr.bf16.mxu1 %v1861_v1  ;;  %v1873_v4 = vld [vmem:[%s2226_s2 + $0x14] ss:$8 sps:$4 sm:$0xff]   ;;  %v1879_v5 = vld [vmem:[%s2226_s2 + $0x10] ss:$8 sps:$4 sm:$0xff]   ;;  %v1885_v6 = vld [vmem:[%s2226_s2 + $0x24] ss:$8 sps:$4 sm:$0xff]  }
  0x17   : > { %615 = vmatpush1.bf16.msra.mxu1 %v1866_v2  ;;  %v1891_v7 = vld [vmem:[%s2226_s2 + $0x20] ss:$8 sps:$4 sm:$0xff]   ;;  %v1900_v9 = vld [vmem:[%s2226_s2 + $0x34] ss:$8 sps:$4 sm:$0xff]   ;;  %v1921_v17 = vld [vmem:[%s2226_s2 + $0x30] ss:$8 sps:$4 sm:$0xff]  }
  0x18   : > { %616 = vmatprep.subr.bf16.mxu1 %v1873_v4  ;;  %v287_v8 = vld [vmem:[%s2225_s1 + $0x8] sm:$0xff]  ;;  %v286_v11 = vld [vmem:[%s2225_s1] sm:$0xff]  ;;  %v288_v13 = vld [vmem:[%s2225_s1 + $0x10] sm:$0xff]  ;;  %vm306_vm0 = vcmask 261120   ;;  %v297_v55 = vshrl.u32 %v296_v54, 7 }
  0x19   : > { %v1676_v12 = vpack.c.bf16 %v289_v10, %v287_v8  ;;  %v1678_v14 = vpack.c.bf16 %v288_v13, %v286_v11  ;;  %v291_v15 = vld [vmem:[%s2225_s1 + $0x28] sm:$0xff]  ;;  %v293_v16 = vld [vmem:[%s2225_s1 + $0x38] sm:$0xff]  ;;  %v290_v19 = vld [vmem:[%s2225_s1 + $0x20] sm:$0xff] }
  0x1a   : > { %v1680_v18 = vpack.c.bf16 %v293_v16, %v291_v15  ;;  %v292_v20 = vld [vmem:[%s2225_s1 + $0x30] sm:$0xff]  ;;  %v1933_v21 = vld [vmem:[%s2226_s2 + $0x44] ss:$8 sps:$4 sm:$0xff]   ;;  %v1939_v23 = vld [vmem:[%s2226_s2 + $0x40] ss:$8 sps:$4 sm:$0xff]   ;;  %v298_v56 = vsub.s32 0, %v297_v55 }
  0x1b   : > { %617 = vmatpush1.bf16.msra.mxu1 %v1879_v5  ;;  %1677 = vmatprep.subr.bf16.mxu0 %v1676_v12  ;;  %v1682_v22 = vpack.c.bf16 %v292_v20, %v290_v19  ;;  %v1945_v24 = vld [vmem:[%s2226_s2 + $0x54] ss:$8 sps:$4 sm:$0xff]   ;;  %v282_v25 = vld [vmem:[%s1851_s27] sm:$0xff]  ;;  %v1953_v26 = vld [vmem:[%s2226_s2 + $0x50] ss:$8 sps:$4 sm:$0xff]   ;;  %v302_v58 = vsub.s32 1, %v297_v55 }
  0x1c   : > { %618 = vmatprep.subr.bf16.mxu1 %v1885_v6  ;;  %1679 = vmatpush1.bf16.msra.mxu0 %v1678_v14  ;;  %v1958_v27 = vld [vmem:[%s2226_s2 + $0x64] ss:$8 sps:$4 sm:$0xff]   ;;  %v1970_v29 = vld [vmem:[%s2226_s2 + $0x60] ss:$8 sps:$4 sm:$0xff]   ;;  %v1975_v30 = vld [vmem:[%s2226_s2 + $0x74] ss:$8 sps:$4 sm:$0xff]  }
  0x1d   : > { %1681 = vmatprep.subr.bf16.mxu0 %v1680_v18  ;;  %v283_v28 = vld [vmem:[%s1851_s27 + $0x8] sm:$0xff]  ;;  %v284_v31 = vld [vmem:[%s1851_s27 + $0x10] sm:$0xff]  ;;  %v285_v36 = vld [vmem:[%s1851_s27 + $0x18] sm:$0xff] }
  0x1e   : > { %v417_v32 = vld [vmem:[#allocation2 + $0x8] sm:$0xff]  ;;  %v1987_v34 = vld [vmem:[%s2226_s2 + $0x70] ss:$8 sps:$4 sm:$0xff]   ;;  %v2011_v38 = vld [vmem:[%s2226_s2 + $0x94] ss:$8 sps:$4 sm:$0xff]  }
  0x1f   : > { %619 = vmatpush1.bf16.msra.mxu1 %v1891_v7  ;;  %v421_v33 = vpack.c.bf16 %v417_v32, %v417_v32  ;;  %v1994_v35 = vld [vmem:[%s2226_s2 + $0x84] ss:$8 sps:$4 sm:$0xff]   ;;  %v2004_v37 = vld [vmem:[%s2226_s2 + $0x80] ss:$8 sps:$4 sm:$0xff]   ;;  %v2019_v39 = vld [vmem:[%s2226_s2 + $0x90] ss:$8 sps:$4 sm:$0xff]  }
  0x20   : > { %620 = vmatprep.subr.bf16.mxu1 %v1900_v9  ;;  %1683 = vmatpush1.bf16.msra.mxu0 %v1682_v22  ;;  %v2025_v40 = vld [vmem:[%s2226_s2 + $0xa4] ss:$8 sps:$4 sm:$0xff]   ;;  %v2033_v41 = vld [vmem:[%s2226_s2 + $0xa0] ss:$8 sps:$4 sm:$0xff]   ;;  %v2039_v42 = vld [vmem:[%s2226_s2 + $0xb4] ss:$8 sps:$4 sm:$0xff]  }
  0x21   : > { %858 = vmatprep.subr.bf16.mxu0 %v1861_v1  ;;  %646 = vmatprep.mubr.bf16.mxu1 %v421_v33  ;;  %v2047_v43 = vld [vmem:[%s2226_s2 + $0xb0] ss:$8 sps:$4 sm:$0xff]   ;;  %v2053_v44 = vld [vmem:[%s2226_s2 + $0xc4] ss:$8 sps:$4 sm:$0xff]   ;;  %v2061_v45 = vld [vmem:[%s2226_s2 + $0xc0] ss:$8 sps:$4 sm:$0xff]  }
  0x22   : > { %v2067_v46 = vld [vmem:[%s2226_s2 + $0xd4] ss:$8 sps:$4 sm:$0xff]   ;;  %v2075_v47 = vld [vmem:[%s2226_s2 + $0xd0] ss:$8 sps:$4 sm:$0xff]   ;;  %v2081_v48 = vld [vmem:[%s2226_s2 + $0xe4] ss:$8 sps:$4 sm:$0xff]  }
  0x23   : > { %621 = vmatpush1.bf16.msra.mxu1 %v1921_v17  ;;  %1528 = vmatmul.mubr.msk.f32.vlgmr.msra.gmra.mrb[0].mxu0 %vm306_vm0, %v282_v25  ;;  %v2089_v49 = vld [vmem:[%s2226_s2 + $0xe0] ss:$8 sps:$4 sm:$0xff]   ;;  %v2095_v50 = vld [vmem:[%s2226_s2 + $0xf4] ss:$8 sps:$4 sm:$0xff]   ;;  %v2103_v51 = vld [vmem:[%s2226_s2 + $0xf0] ss:$8 sps:$4 sm:$0xff]  }
  0x24   : > { %622 = vmatprep.subr.bf16.mxu1 %v1933_v21  ;;  %389 = vmatprep.mubr.f32.mxu0 %v1799_v3  ;;  %v416_v52 = vld [vmem:[#allocation2] sm:$0xff] }
  0x25   : > { %859 = vmatpush1.bf16.msra.mxu0 %v1866_v2  ;;  %v420_v53 = vpack.c.bf16 %v416_v52, %v416_v52  ;;  %v294_v57 = vld [vmem:[%s2227_s3] sm:$0x3] }
  0x26   : > { %860 = vmatprep.subr.bf16.mxu0 %v1873_v4  ;;  %v299_v59 = vrot.slane %v294_v57, %v298_v56  ;;  %v303_v60 = vrot.slane %v294_v57, %v302_v58 }
  0x27   : > { %623 = vmatpush1.bf16.msra.mxu1 %v1939_v23  ;;  %1529 = vmatmul.mubr.msk.f32.gmra.mrb[2].mxu0 %vm306_vm0, %v283_v28 }
  0x28   : > { %624 = vmatprep.subr.bf16.mxu1 %v1945_v24  ;;  %395 = vmatprep.mubr.f32.mxu0 %v1799_v3 }
  0x29   : > { %861 = vmatpush1.bf16.msra.mxu0 %v1879_v5 }
  0x2a   : > { %862 = vmatprep.subr.bf16.mxu0 %v1885_v6 }
  0x2b   : > { %625 = vmatpush1.bf16.msra.mxu1 %v1953_v26  ;;  %1530 = vmatmul.mubr.msk.f32.gmra.mrb[4].mxu0 %vm306_vm0, %v284_v31 }
  0x2c   : > { %626 = vmatprep.subr.bf16.mxu1 %v1958_v27  ;;  %401 = vmatprep.mubr.f32.mxu0 %v1799_v3 }
  0x2d   : > { %863 = vmatpush1.bf16.msra.mxu0 %v1891_v7 }
  0x2e   : > { %864 = vmatprep.subr.bf16.mxu0 %v1900_v9 }
  0x2f   : > { %627 = vmatpush1.bf16.msra.mxu1 %v1970_v29  ;;  %1531 = vmatmul.mubr.msk.f32.gmra.mrb[6].mxu0 %vm306_vm0, %v285_v36 }
  0x30   : > { %628 = vmatprep.subr.bf16.mxu1 %v1975_v30 }
  0x31   : > { %865 = vmatpush1.bf16.msra.mxu0 %v1921_v17 }
  0x32   : > { %866 = vmatprep.subr.bf16.mxu0 %v1933_v21 }
  0x33   : > { %629 = vmatpush1.bf16.msra.mxu1 %v1987_v34 }
  0x34   : > { %630 = vmatprep.subr.bf16.mxu1 %v1994_v35 }
  0x35   : > { %867 = vmatpush1.bf16.msra.mxu0 %v1939_v23 }
  0x36   : > { %868 = vmatprep.subr.bf16.mxu0 %v1945_v24 }
  0x37   : > { %631 = vmatpush1.bf16.msra.mxu1 %v2004_v37 }
  0x38   : > { %632 = vmatprep.subr.bf16.mxu1 %v2011_v38 }
  0x39   : > { %869 = vmatpush1.bf16.msra.mxu0 %v1953_v26 }
  0x3a   : > { %870 = vmatprep.subr.bf16.mxu0 %v1958_v27 }
  0x3b   : > { %633 = vmatpush1.bf16.msra.mxu1 %v2019_v39 }
  0x3c   : > { %634 = vmatprep.subr.bf16.mxu1 %v2025_v40 }
  0x3d   : > { %871 = vmatpush1.bf16.msra.mxu0 %v1970_v29 }
  0x3e   : > { %872 = vmatprep.subr.bf16.mxu0 %v1975_v30 }
  0x3f   : > { %635 = vmatpush1.bf16.msra.mxu1 %v2033_v41 }
  0x40   : > { %636 = vmatprep.subr.bf16.mxu1 %v2039_v42 }
  0x41   : > { %873 = vmatpush1.bf16.msra.mxu0 %v1987_v34 }
  0x42   : > { %874 = vmatprep.subr.bf16.mxu0 %v1994_v35 }
  0x43   : > { %637 = vmatpush1.bf16.msra.mxu1 %v2047_v43 }
  0x44   : > { %638 = vmatprep.subr.bf16.mxu1 %v2053_v44 }
  0x45   : > { %875 = vmatpush1.bf16.msra.mxu0 %v2004_v37 }
  0x46   : > { %876 = vmatprep.subr.bf16.mxu0 %v2011_v38 }
  0x47   : > { %639 = vmatpush1.bf16.msra.mxu1 %v2061_v45 }
  0x48   : > { %640 = vmatprep.subr.bf16.mxu1 %v2067_v46 }
  0x49   : > { %877 = vmatpush1.bf16.msra.mxu0 %v2019_v39 }
  0x4a   : > { %878 = vmatprep.subr.bf16.mxu0 %v2025_v40 }
  0x4b   : > { %641 = vmatpush1.bf16.msra.mxu1 %v2075_v47 }
  0x4c   : > { %642 = vmatprep.subr.bf16.mxu1 %v2081_v48 }
  0x4d   : > { %879 = vmatpush1.bf16.msra.mxu0 %v2033_v41 }
  0x4e   : > { %880 = vmatprep.subr.bf16.mxu0 %v2039_v42 }
  0x4f   : > { %643 = vmatpush1.bf16.msra.mxu1 %v2089_v49 }
  0x50   : > { %644 = vmatprep.subr.bf16.mxu1 %v2095_v50 }
  0x51   : > { %881 = vmatpush1.bf16.msra.mxu0 %v2047_v43 }
  0x52   : > { %882 = vmatprep.subr.bf16.mxu0 %v2053_v44 }
  0x53   : > { %645 = vmatpush1.bf16.msra.mxu1 %v2103_v51 }
  0x54   : > { %1102 = vmatprep.subr.bf16.mxu1 %v1861_v1 }
  0x55   : > { %883 = vmatpush1.bf16.msra.mxu0 %v2061_v45 }
  0x56   : > { %647 = vmatmul.mubr.bf16.vlgmr.msra.gmra.mrb[0].mxu1 %v420_v53  ;;  %884 = vmatprep.subr.bf16.mxu0 %v2067_v46 }
  0x57   : > { %1103 = vmatpush1.bf16.msra.mxu1 %v1866_v2 }
  0x58   : > { %1104 = vmatprep.subr.bf16.mxu1 %v1873_v4 }
  0x59   : > { %885 = vmatpush1.bf16.msra.mxu0 %v2075_v47 }
  0x5a   : > { %886 = vmatprep.subr.bf16.mxu0 %v2081_v48 }
  0x5b   : > { %1105 = vmatpush1.bf16.msra.mxu1 %v1879_v5 }
  0x5c   : > { %1106 = vmatprep.subr.bf16.mxu1 %v1885_v6 }
  0x5d   : > { %887 = vmatpush1.bf16.msra.mxu0 %v2089_v49 }
  0x5e   : > { %888 = vmatprep.subr.bf16.mxu0 %v2095_v50 }
  0x5f   : > { %1107 = vmatpush1.bf16.msra.mxu1 %v1891_v7 }
  0x60   : > { %1108 = vmatprep.subr.bf16.mxu1 %v1900_v9 }
  0x61   : > { %889 = vmatpush1.bf16.msra.mxu0 %v2103_v51 }
  0x62   : > { %1346 = vmatprep.subr.bf16.mxu0 %v1861_v1 }
  0x63   : > { %1109 = vmatpush1.bf16.msra.mxu1 %v1921_v17 }
  0x64   : > { %1110 = vmatprep.subr.bf16.mxu1 %v1933_v21 }
  0x67   : > { %1111 = vmatpush1.bf16.msra.mxu1 %v1939_v23 }
  0x68   : > { %1112 = vmatprep.subr.bf16.mxu1 %v1945_v24 }
  0x6b   : > { %1113 = vmatpush1.bf16.msra.mxu1 %v1953_v26 }
  0x6c   : > { %1114 = vmatprep.subr.bf16.mxu1 %v1958_v27 }
  0x6f   : > { %1115 = vmatpush1.bf16.msra.mxu1 %v1970_v29 }
  0x70   : > { %1116 = vmatprep.subr.bf16.mxu1 %v1975_v30 }
  0x73   : > { %1117 = vmatpush1.bf16.msra.mxu1 %v1987_v34 }
  0x74   : > { %1118 = vmatprep.subr.bf16.mxu1 %v1994_v35 }
  0x77   : > { %1119 = vmatpush1.bf16.msra.mxu1 %v2004_v37 }
  0x78   : > { %1120 = vmatprep.subr.bf16.mxu1 %v2011_v38 }
  0x7b   : > { %1121 = vmatpush1.bf16.msra.mxu1 %v2019_v39 }
  0x7c   : > { %1122 = vmatprep.subr.bf16.mxu1 %v2025_v40 }
  0x7f   : > { %1123 = vmatpush1.bf16.msra.mxu1 %v2033_v41 }
  0x80   : > { %1124 = vmatprep.subr.bf16.mxu1 %v2039_v42 }
  0x83   : > { %1125 = vmatpush1.bf16.msra.mxu1 %v2047_v43 }
  0x84   : > { %1126 = vmatprep.subr.bf16.mxu1 %v2053_v44 }
  0x87   : > { %1127 = vmatpush1.bf16.msra.mxu1 %v2061_v45 }
  0x88   : > { %1128 = vmatprep.subr.bf16.mxu1 %v2067_v46 }
  0x8b   : > { %1129 = vmatpush1.bf16.msra.mxu1 %v2075_v47 }
  0x8c   : > { %1130 = vmatprep.subr.bf16.mxu1 %v2081_v48 }
  0x8f   : > { %1131 = vmatpush1.bf16.msra.mxu1 %v2089_v49 }
  0x90   : > { %1132 = vmatprep.subr.bf16.mxu1 %v2095_v50 }
  0x93   : > { %1133 = vmatpush1.bf16.msra.mxu1 %v2103_v51 }
  0xf6   : > { %v385_v61 = vpop.f32.mrb[0].mxu0 }
  0xf7   : > { %v386_v62 = vadd.f32 %v385_v61, %v299_v59  ;;  %v387_v63 = vpop.f32.mrb[1].mxu0 }
  0xf8   : > { %v388_v0 = vadd.f32 %v387_v63, %v303_v60 }
  0xf9   : > { %408 = vst [vmem:[%s1856_s30] sm:$0xff] %v386_v62 }
  0xfa   : > { %409 = vst [vmem:[%s1856_s30 + $0x8] sm:$0xff] %v388_v0  ;;  %v391_v1 = vpop.f32.mrb[2].mxu0 }
  0xfb   : > { %v392_v3 = vadd.f32 %v391_v1, %v299_v59  ;;  %v393_v8 = vpop.f32.mrb[3].mxu0 }
  0xfc   : > { %v394_v10 = vadd.f32 %v393_v8, %v303_v60 }
  0xfd   : > { %410 = vst [vmem:[%s1856_s30 + $0x10] sm:$0xff] %v392_v3 }
  0xfe   : > { %411 = vst [vmem:[%s1856_s30 + $0x18] sm:$0xff] %v394_v10  ;;  %v397_v11 = vpop.f32.mrb[4].mxu0 }
  0xff   : > { %v398_v12 = vadd.f32 %v397_v11, %v299_v59  ;;  %v399_v13 = vpop.f32.mrb[5].mxu0 }
 0x100   : > { %v400_v14 = vadd.f32 %v399_v13, %v303_v60  ;;  %v418_v20 = vld [vmem:[%s1856_s30] sm:$0xff] }
 0x101   : > { %412 = vst [vmem:[%s1856_s30 + $0x20] sm:$0xff] %v398_v12  ;;  %v419_v28 = vld [vmem:[%s1856_s30 + $0x8] sm:$0xff] }
 0x102   : > { %413 = vst [vmem:[%s1856_s30 + $0x28] sm:$0xff] %v400_v14  ;;  %v403_v15 = vpop.f32.mrb[6].mxu0 }
 0x103   : > { %v404_v16 = vadd.f32 %v403_v15, %v299_v59  ;;  %v405_v18 = vpop.f32.mrb[7].mxu0 }
 0x104   : > { %v406_v19 = vadd.f32 %v405_v18, %v303_v60 }
 0x105   : > { %414 = vst [vmem:[%s1856_s30 + $0x30] sm:$0xff] %v404_v16 }
 0x106   : > { %415 = vst [vmem:[%s1856_s30 + $0x38] sm:$0xff] %v406_v19 }
 0x129   : > { %v648_v22 = vpop.f32.mrb[0].mxu1 }
 0x12a   : > { %v655_v25 = vadd.f32 %v648_v22, %v418_v20  ;;  %v650_v31 = vpop.f32.mrb[1].mxu1 }
 0x12b   : > { %v656_v32 = vadd.f32 %v650_v31, %v419_v28  ;;  %v652_v33 = vpop.f32.mrb[2].mxu1 }
 0x12c   : > { %1758 = vtanh.f32 %v655_v25  ;;  %v653_v36 = vpop.f32.mrb[3].mxu1 }
 0x12d   : > { %1760 = vtanh.f32 %v656_v32 }
 0x136   : > { %v1759_v52 = vpop.eup %1758 }
 0x137   : > { %v1761_v53 = vpop.eup %1760  ;;  %659 = vst [vmem:[%s1856_s30] sm:$0xff] %v1759_v52  ;;  %v664_v55 = vpack.c.bf16 %v1759_v52, %v1759_v52 }
 0x138   : > { %660 = vst [vmem:[%s1856_s30 + $0x8] sm:$0xff] %v1761_v53  ;;  %v665_v54 = vpack.c.bf16 %v1761_v53, %v1761_v53 }
 0x13a   : > { %890 = vmatprep.mubr.bf16.mxu0 %v665_v54 }
 0x13b   : > { %891 = vmatmul.mubr.bf16.vlgmr.msra.gmra.mrb[8].mxu0 %v664_v55 }
 0x13c   : > { %1347 = vmatpush1.bf16.msra.mxu0 %v1866_v2  ;;  %v1564_v2 = vld [vmem:[%s1856_s30 + $0x10] sm:$0xff] }
 0x13d   : > { %1348 = vmatprep.subr.bf16.mxu0 %v1873_v4 }
 0x140   : > { %1349 = vmatpush1.bf16.msra.mxu0 %v1879_v5 }
 0x141   : > { %1350 = vmatprep.subr.bf16.mxu0 %v1885_v6  ;;  %v1565_v6 = vld [vmem:[%s1856_s30 + $0x18] sm:$0xff] }
 0x144   : > { %1351 = vmatpush1.bf16.msra.mxu0 %v1891_v7 }
 0x145   : > { %1352 = vmatprep.subr.bf16.mxu0 %v1900_v9 }
 0x148   : > { %1353 = vmatpush1.bf16.msra.mxu0 %v1921_v17 }
 0x149   : > { %1354 = vmatprep.subr.bf16.mxu0 %v1933_v21 }
 0x14c   : > { %1355 = vmatpush1.bf16.msra.mxu0 %v1939_v23 }
 0x14d   : > { %1356 = vmatprep.subr.bf16.mxu0 %v1945_v24 }
 0x150   : > { %1357 = vmatpush1.bf16.msra.mxu0 %v1953_v26 }
 0x151   : > { %1358 = vmatprep.subr.bf16.mxu0 %v1958_v27 }
 0x154   : > { %1359 = vmatpush1.bf16.msra.mxu0 %v1970_v29  ;;  %v1600_v29 = vld [vmem:[%s1856_s30 + $0x20] sm:$0xff] }
 0x155   : > { %1360 = vmatprep.subr.bf16.mxu0 %v1975_v30 }
 0x158   : > { %1361 = vmatpush1.bf16.msra.mxu0 %v1987_v34 }
 0x159   : > { %1362 = vmatprep.subr.bf16.mxu0 %v1994_v35  ;;  %v1601_v35 = vld [vmem:[%s1856_s30 + $0x28] sm:$0xff] }
 0x15c   : > { %1363 = vmatpush1.bf16.msra.mxu0 %v2004_v37 }
 0x15d   : > { %1364 = vmatprep.subr.bf16.mxu0 %v2011_v38 }
 0x160   : > { %1365 = vmatpush1.bf16.msra.mxu0 %v2019_v39 }
 0x161   : > { %1366 = vmatprep.subr.bf16.mxu0 %v2025_v40 }
 0x164   : > { %1367 = vmatpush1.bf16.msra.mxu0 %v2033_v41 }
 0x165   : > { %1368 = vmatprep.subr.bf16.mxu0 %v2039_v42 }
 0x168   : > { %1369 = vmatpush1.bf16.msra.mxu0 %v2047_v43 }
 0x169   : > { %1370 = vmatprep.subr.bf16.mxu0 %v2053_v44 }
 0x16c   : > { %1371 = vmatpush1.bf16.msra.mxu0 %v2061_v45  ;;  %v1636_v45 = vld [vmem:[%s1856_s30 + $0x30] sm:$0xff] }
 0x16d   : > { %1372 = vmatprep.subr.bf16.mxu0 %v2067_v46 }
 0x170   : > { %1373 = vmatpush1.bf16.msra.mxu0 %v2075_v47 }
 0x171   : > { %1374 = vmatprep.subr.bf16.mxu0 %v2081_v48  ;;  %v1637_v48 = vld [vmem:[%s1856_s30 + $0x38] sm:$0xff] }
 0x174   : > { %1375 = vmatpush1.bf16.msra.mxu0 %v2089_v49 }
 0x175   : > { %1376 = vmatprep.subr.bf16.mxu0 %v2095_v50 }
 0x178   : > { %1377 = vmatpush1.bf16.msra.mxu0 %v2103_v51 }
 0x20e   : > { %v892_v4 = vpop.f32.mrb[8].mxu0 }
 0x20f   : > { %v899_v5 = vadd.f32 %v1564_v2, %v892_v4  ;;  %v894_v7 = vpop.f32.mrb[9].mxu0 }
 0x210   : > { %v900_v9 = vadd.f32 %v1565_v6, %v894_v7  ;;  %v896_v17 = vpop.f32.mrb[10].mxu0 }
 0x211   : > { %1762 = vtanh.f32 %v899_v5  ;;  %v897_v21 = vpop.f32.mrb[11].mxu0 }
 0x212   : > { %1764 = vtanh.f32 %v900_v9 }
 0x21b   : > { %v1763_v23 = vpop.eup %1762 }
 0x21c   : > { %v1765_v24 = vpop.eup %1764  ;;  %1598 = vst [vmem:[%s1856_s30 + $0x10] sm:$0xff] %v1763_v23  ;;  %v908_v27 = vpack.c.bf16 %v1763_v23, %v1763_v23 }
 0x21d   : > { %1599 = vst [vmem:[%s1856_s30 + $0x18] sm:$0xff] %v1765_v24  ;;  %v909_v26 = vpack.c.bf16 %v1765_v24, %v1765_v24 }
 0x21f   : > { %1134 = vmatprep.mubr.bf16.mxu1 %v909_v26 }
 0x220   : > { %1135 = vmatmul.mubr.bf16.vlgmr.msra.gmra.mrb[4].mxu1 %v908_v27 }
 0x2f3   : > { %v1136_v30 = vpop.f32.mrb[4].mxu1 }
 0x2f4   : > { %v1143_v34 = vadd.f32 %v1600_v29, %v1136_v30  ;;  %v1138_v37 = vpop.f32.mrb[5].mxu1 }
 0x2f5   : > { %v1144_v38 = vadd.f32 %v1601_v35, %v1138_v37  ;;  %v1140_v39 = vpop.f32.mrb[6].mxu1 }
 0x2f6   : > { %1766 = vtanh.f32 %v1143_v34  ;;  %v1141_v40 = vpop.f32.mrb[7].mxu1 }
 0x2f7   : > { %1768 = vtanh.f32 %v1144_v38 }
 0x300   : > { %v1767_v41 = vpop.eup %1766 }
 0x301   : > { %v1769_v42 = vpop.eup %1768  ;;  %1634 = vst [vmem:[%s1856_s30 + $0x20] sm:$0xff] %v1767_v41  ;;  %v1152_v44 = vpack.c.bf16 %v1767_v41, %v1767_v41 }
 0x302   : > { %1635 = vst [vmem:[%s1856_s30 + $0x28] sm:$0xff] %v1769_v42  ;;  %v1153_v43 = vpack.c.bf16 %v1769_v42, %v1769_v42 }
 0x304   : > { %1378 = vmatprep.mubr.bf16.mxu0 %v1153_v43 }
 0x305   : > { %1379 = vmatmul.mubr.bf16.vlgmr.msra.gmra.mrb[12].mxu0 %v1152_v44 }
 0x3d8   : > { %v1380_v46 = vpop.f32.mrb[12].mxu0 }
 0x3d9   : > { %v1387_v47 = vadd.f32 %v1636_v45, %v1380_v46  ;;  %v1382_v49 = vpop.f32.mrb[13].mxu0 }
 0x3da   : > { %v1388_v50 = vadd.f32 %v1637_v48, %v1382_v49  ;;  %v1384_v51 = vpop.f32.mrb[14].mxu0 }
 0x3db   : > { %1770 = vtanh.f32 %v1387_v47  ;;  %v1385_v56 = vpop.f32.mrb[15].mxu0 }
 0x3dc   : > { %1772 = vtanh.f32 %v1388_v50 }
 0x3e5   : > { %v1771_v57 = vpop.eup %1770 }
 0x3e6   : > { %v1773_v58 = vpop.eup %1772  ;;  %1670 = vst [vmem:[%s1856_s30 + $0x30] sm:$0xff] %v1771_v57  ;;  %1393 = vst [vmem:[#allocation2] sm:$0xff] %v1771_v57 }
 0x3e7   : > { %1395 = vst [vmem:[%s2229_s5] sm:$0xff] %v1771_v57  ;;  %1671 = vst [vmem:[%s1856_s30 + $0x38] sm:$0xff] %v1773_v58 }
 0x3e8   : > { %1394 = vst [vmem:[#allocation2 + $0x8] sm:$0xff] %v1773_v58  ;;  %1396 = vst [vmem:[%s2229_s5 + $0x8] sm:$0xff] %v1773_v58 }
 0x3e9 PF: > { %s16_s20 = sadd.s32 1, %s1796_s20   ;;  %s2230_s18 = smov %s1792_s19 }
 0x3ea   : > { %p13_p6 = scmp.ge.s32.totalorder %s16_s20, 4   ;;  %s2231_s19 = smov %s2233_s21 }
 0x3ec   :  { %15 = sbr.rel (!%p13_p6) target bundleno = 2 (0x2), region = 85 }

</bundles_post_ra>
